<compile_context>
chip_gen: v6e
topology: v6e:2x2x1
jax: 0.10.0
libtpu: 0.0.40
codegen_flags: <defaults>
</compile_context>

<pallas_src>
import math

import jax
import jax.numpy as jnp
from jax.experimental import pallas as pl
from jax.experimental.pallas import tpu as pltpu

EPS = 1e-5  # PyTorch BatchNorm2d default


# ---------------------------------------------------------------------------
# Sizing helpers
# ---------------------------------------------------------------------------

def _vmem_limits():
    """Return (vmem_limit_bytes to request, block budget for tile sizing)."""
    try:
        phys = int(pltpu.get_tpu_info().vmem_capacity_bytes)
    except Exception:
        phys = 64 * 1024 * 1024            # conservative: v7x has 64 MiB per TC
    limit = min((phys * 3) // 4, 112 * 1024 * 1024)   # leave compiler headroom
    budget = limit - 4 * 1024 * 1024                  # temps / semaphores etc.
    return limit, budget


def _sublane_step(itemsize):
    # Packed sublane count per vreg: f32 -> 8, bf16 -> 16, int8/fp8 -> 32.
    return 32 // itemsize


def _pick_tile_c(C, per_chan_block_bytes, budget, step):
    """Channel tile for the single-pass kernel, or None if nothing fits.

    Legal tiles: full C, or divisors of C that are multiples of the sublane
    step.  Footprint per grid step ~= (input + output) * double buffering.
    """
    cands = [C] + [d for d in range(step, C, step) if C % d == 0]
    fitting = [tc for tc in cands if 4 * tc * per_chan_block_bytes <= budget]
    if not fitting:
        return None
    # Prefer >= 4 grid steps with an even count (pipeline overlap + balanced
    # v7x megacore sharding), then the largest such tile to amortize the
    # ~0.35 us per-step overhead.
    for pred in (lambda tc: (C // tc) >= 4 and (C // tc) % 2 == 0,
                 lambda tc: (C // tc) >= 2,
                 lambda tc: True):
        good = [tc for tc in fitting if pred(tc)]
        if good:
            return max(good)
    return max(fitting)


def _pick_tile_b(B, per_b_block_bytes, budget):
    """Largest divisor of B whose (in+out, double-buffered) block fits."""
    best = 1
    for tb in range(1, B + 1):
        if B % tb == 0 and 4 * tb * per_b_block_bytes <= budget:
            best = tb
    return best


# ---------------------------------------------------------------------------
# Kernels
# ---------------------------------------------------------------------------

def _cbn_fused_kernel(x_ref, scale_ref, shift_ref, o_ref):
    # Block shapes: x/o (B, TILE_C, HW); scale/shift (B, TILE_C, 1).
    n = x_ref.shape[0] * x_ref.shape[2]                 # true count: B * H * W
    x = x_ref[...].astype(jnp.float32)
    mean = jnp.sum(x, axis=(0, 2), keepdims=True) / n             # (1, TC, 1)
    # Recompute the centered value from the VMEM ref so no block-sized
    # intermediate has to stay live across the reduction barrier.
    d = x_ref[...].astype(jnp.float32) - mean
    var = jnp.sum(d * d, axis=(0, 2), keepdims=True) / n          # biased var
    inv = jax.lax.rsqrt(var + EPS)
    a = scale_ref[...].astype(jnp.float32) * inv                  # (B, TC, 1)
    b = shift_ref[...].astype(jnp.float32) - mean * a             # (B, TC, 1)
    # Single fused elementwise pass: 1 mul + 1 add per element.
    o_ref[...] = (x_ref[...].astype(jnp.float32) * a + b).astype(o_ref.dtype)


def _cbn_stats_kernel(x_ref, sum_ref, sq_ref):
    # x: (TILE_B, TILE_C, HW); sum/sq: (TILE_C, 1), accumulated across the
    # batch grid axis (last, "arbitrary") -- output block stays resident.
    @pl.when(pl.program_id(1) == 0)
    def _():
        sum_ref[...] = jnp.zeros_like(sum_ref)
        sq_ref[...] = jnp.zeros_like(sq_ref)

    x = x_ref[...].astype(jnp.float32)
    s = jnp.sum(x, axis=2, keepdims=True)               # (TB, TC, 1)
    q = jnp.sum(x * x, axis=2, keepdims=True)           # (TB, TC, 1)
    sum_ref[...] += jnp.sum(s, axis=0)                  # (TC, 1)
    sq_ref[...] += jnp.sum(q, axis=0)                   # (TC, 1)


def _cbn_apply_kernel(x_ref, a_ref, b_ref, o_ref):
    # x/o: (TILE_B, TILE_C, HW); a/b: (TILE_B, TILE_C, 1).
    o_ref[...] = (x_ref[...].astype(jnp.float32) * a_ref[...]
                  + b_ref[...]).astype(o_ref.dtype)


# ---------------------------------------------------------------------------
# Wrapper
# ---------------------------------------------------------------------------

def cbn2d_forward(x, y, scale_w, shift_w, *, force_two_pass=False):
    """x: [B, C, H, W] (NCHW, as PyTorch); y: [B] int32 class ids."""
    B, C, H, W = x.shape
    HW = H * W
    itemsize = jnp.dtype(x.dtype).itemsize
    step = _sublane_step(itemsize)
    vmem_limit, budget = _vmem_limits()

    # Embedding lookups (parameter gather) stay in plain JAX.
    scale = scale_w[y].astype(jnp.float32)               # [B, C]
    shift = shift_w[y].astype(jnp.float32)               # [B, C]

    x_k = x.reshape(B, C, HW)                            # free view

    tile_c = None if force_two_pass else _pick_tile_c(
        C, B * HW * itemsize, budget, step)

    if tile_c is not None:
        # ----- single-pass fused path: one HBM read + one HBM write of x -----
        out_k = pl.pallas_call(
            _cbn_fused_kernel,
            out_shape=jax.ShapeDtypeStruct((B, C, HW), x.dtype),
            grid_spec=pltpu.PrefetchScalarGridSpec(
                num_scalar_prefetch=0,
                grid=(C // tile_c,),
                in_specs=[
                    pl.BlockSpec((B, tile_c, HW), lambda c: (0, c, 0)),
                    pl.BlockSpec((B, tile_c, 1), lambda c: (0, c, 0)),
                    pl.BlockSpec((B, tile_c, 1), lambda c: (0, c, 0)),
                ],
                out_specs=pl.BlockSpec((B, tile_c, HW), lambda c: (0, c, 0)),
            ),
            compiler_params=pltpu.CompilerParams(
                dimension_semantics=("parallel",),
                vmem_limit_bytes=vmem_limit,
            ),
        )(x_k, scale.reshape(B, C, 1), shift.reshape(B, C, 1))
        return out_k.reshape(B, C, H, W)

    # ----- two-pass fallback: batch-tiled stats + elementwise apply -----
    tile_c = step if (C % step == 0 and C > step) else C
    tile_b = _pick_tile_b(B, tile_c * HW * itemsize, budget)
    nc, nb = C // tile_c, B // tile_b
    n = B * HW

    sums, sqs = pl.pallas_call(
        _cbn_stats_kernel,
        out_shape=(jax.ShapeDtypeStruct((C, 1), jnp.float32),
                   jax.ShapeDtypeStruct((C, 1), jnp.float32)),
        grid_spec=pltpu.PrefetchScalarGridSpec(
            num_scalar_prefetch=0,
            grid=(nc, nb),
            in_specs=[pl.BlockSpec((tile_b, tile_c, HW),
                                   lambda c, b: (b, c, 0))],
            out_specs=(pl.BlockSpec((tile_c, 1), lambda c, b: (c, 0)),
                       pl.BlockSpec((tile_c, 1), lambda c, b: (c, 0))),
        ),
        compiler_params=pltpu.CompilerParams(
            dimension_semantics=("parallel", "arbitrary"),
            vmem_limit_bytes=vmem_limit,
        ),
    )(x_k)

    mean = sums[:, 0] / n                                          # (C,)
    # TODO(synk): one-pass E[x^2]-E[x]^2 loses precision when |mean| >> std;
    # accumulation is f32 and the clamp guards tiny negatives.
    var = jnp.maximum(sqs[:, 0] / n - mean * mean, 0.0)
    inv = jax.lax.rsqrt(var + EPS)                                 # (C,)
    a = scale * inv[None, :]                                       # (B, C)
    b = shift - mean[None, :] * a                                  # (B, C)

    out_k = pl.pallas_call(
        _cbn_apply_kernel,
        out_shape=jax.ShapeDtypeStruct((B, C, HW), x.dtype),
        grid_spec=pltpu.PrefetchScalarGridSpec(
            num_scalar_prefetch=0,
            grid=(nc, nb),
            in_specs=[
                pl.BlockSpec((tile_b, tile_c, HW), lambda c, b: (b, c, 0)),
                pl.BlockSpec((tile_b, tile_c, 1), lambda c, b: (b, c, 0)),
                pl.BlockSpec((tile_b, tile_c, 1), lambda c, b: (b, c, 0)),
            ],
            out_specs=pl.BlockSpec((tile_b, tile_c, HW),
                                   lambda c, b: (b, c, 0)),
        ),
        compiler_params=pltpu.CompilerParams(
            dimension_semantics=("parallel", "parallel"),
            vmem_limit_bytes=vmem_limit,
        ),
    )(x_k, a.reshape(B, C, 1), b.reshape(B, C, 1))
    return out_k.reshape(B, C, H, W)


# ---------------------------------------------------------------------------
# Pure-JAX reference (mirrors the PyTorch forward, training-mode BN)
# ---------------------------------------------------------------------------

def cbn2d_reference(x, y, scale_w, shift_w):
    mean = jnp.mean(x, axis=(0, 2, 3), keepdims=True)
    var = jnp.mean((x - mean) ** 2, axis=(0, 2, 3), keepdims=True)
    xn = (x - mean) * jax.lax.rsqrt(var + EPS)
    return xn * scale_w[y][:, :, None, None] + shift_w[y][:, :, None, None]


if __name__ == "__main__":
    key = jax.random.PRNGKey(0)
    kx, ky, ks, kx2, ky2, ks2 = jax.random.split(key, 6)
    y_dim = 10

    # --- primary test: single-pass fused path (bn_f = C = 4) ---
    B, C, H, W = 2, 4, 16, 16
    x = jax.random.normal(kx, (B, C, H, W), dtype=jnp.float32)
    y = jax.random.randint(ky, (B,), 0, y_dim, dtype=jnp.int32)
    # Parameter init matching the module: xavier_uniform gain=1.0 (scale),
    # gain=0.0 -> zeros (shift).
    bound = math.sqrt(6.0 / (y_dim + C))
    scale_w = jax.random.uniform(ks, (y_dim, C), jnp.float32, -bound, bound)
    shift_w = jnp.zeros((y_dim, C), jnp.float32)

    out = jax.block_until_ready(cbn2d_forward(x, y, scale_w, shift_w))
    ref = cbn2d_reference(x, y, scale_w, shift_w)
    assert out.shape == (B, C, H, W)
    assert jnp.allclose(out, ref, atol=1e-4, rtol=1e-4), "single-pass mismatch"

    # --- secondary test: exercise the batch-tiled two-pass fallback ---
    B2, C2, H2, W2 = 4, 16, 8, 8
    x2 = jax.random.normal(kx2, (B2, C2, H2, W2), dtype=jnp.float32)
    y2 = jax.random.randint(ky2, (B2,), 0, y_dim, dtype=jnp.int32)
    bound2 = math.sqrt(6.0 / (y_dim + C2))
    scale_w2 = jax.random.uniform(ks2, (y_dim, C2), jnp.float32, -bound2, bound2)
    shift_w2 = jnp.zeros((y_dim, C2), jnp.float32)

    out2 = jax.block_until_ready(
        cbn2d_forward(x2, y2, scale_w2, shift_w2, force_two_pass=True))
    ref2 = cbn2d_reference(x2, y2, scale_w2, shift_w2)
    assert out2.shape == (B2, C2, H2, W2)
    assert jnp.allclose(out2, ref2, atol=1e-4, rtol=1e-4), "two-pass mismatch"

    print("KERNEL_OK")
</pallas_src>

<mosaic_0001>
module attributes {stable_mosaic.version = 11 : i64} {
  func.func @_cbn_fused_kernel(%arg0: i32, %arg1: memref<2x4x256xf32, #tpu.memory_space<vmem>>, %arg2: memref<2x4x1xf32, #tpu.memory_space<vmem>>, %arg3: memref<2x4x1xf32, #tpu.memory_space<vmem>>, %arg4: memref<2x4x256xf32, #tpu.memory_space<vmem>>) attributes {dimension_semantics = [#tpu.dimension_semantics<parallel>], iteration_bounds = array<i64: 1>, scalar_prefetch = 0 : i64, scratch_operands = 0 : i64, tpu.core_type = #tpu.core_type<tc>, window_params = [{transform_indices = @transform_0, window_bounds = array<i64: 2, 4, 256>}, {transform_indices = @transform_1, window_bounds = array<i64: 2, 4, 1>}, {transform_indices = @transform_2, window_bounds = array<i64: 2, 4, 1>}, {transform_indices = @transform_3, window_bounds = array<i64: 2, 4, 256>}]} {
    %c0 = arith.constant 0 : index
    %c0_0 = arith.constant 0 : index
    %c0_1 = arith.constant 0 : index
    %0 = vector.load %arg1[%c0, %c0_0, %c0_1] : memref<2x4x256xf32, #tpu.memory_space<vmem>>, vector<2x4x256xf32>
    %cst = arith.constant dense<0.000000e+00> : vector<4xf32>
    %1 = vector.multi_reduction <add>, %0, %cst [0, 2] : vector<2x4x256xf32> to vector<4xf32>
    %2 = vector.shape_cast %1 : vector<4xf32> to vector<1x4x1xf32>
    %cst_2 = arith.constant 5.120000e+02 : f32
    %3 = vector.broadcast %cst_2 : f32 to vector<1x4x1xf32>
    %4 = arith.divf %2, %3 : vector<1x4x1xf32>
    %c0_3 = arith.constant 0 : index
    %c0_4 = arith.constant 0 : index
    %c0_5 = arith.constant 0 : index
    %5 = vector.load %arg1[%c0_3, %c0_4, %c0_5] : memref<2x4x256xf32, #tpu.memory_space<vmem>>, vector<2x4x256xf32>
    %6 = vector.broadcast %4 : vector<1x4x1xf32> to vector<2x4x256xf32>
    %7 = arith.subf %5, %6 : vector<2x4x256xf32>
    %8 = arith.mulf %7, %7 : vector<2x4x256xf32>
    %cst_6 = arith.constant dense<0.000000e+00> : vector<4xf32>
    %9 = vector.multi_reduction <add>, %8, %cst_6 [0, 2] : vector<2x4x256xf32> to vector<4xf32>
    %10 = vector.shape_cast %9 : vector<4xf32> to vector<1x4x1xf32>
    %cst_7 = arith.constant 5.120000e+02 : f32
    %11 = vector.broadcast %cst_7 : f32 to vector<1x4x1xf32>
    %12 = arith.divf %10, %11 : vector<1x4x1xf32>
    %cst_8 = arith.constant 9.99999974E-6 : f32
    %13 = vector.broadcast %cst_8 : f32 to vector<1x4x1xf32>
    %14 = arith.addf %12, %13 : vector<1x4x1xf32>
    %15 = math.rsqrt %14 : vector<1x4x1xf32>
    %c0_9 = arith.constant 0 : index
    %c0_10 = arith.constant 0 : index
    %c0_11 = arith.constant 0 : index
    %16 = vector.load %arg2[%c0_9, %c0_10, %c0_11] : memref<2x4x1xf32, #tpu.memory_space<vmem>>, vector<2x4x1xf32>
    %17 = vector.broadcast %15 : vector<1x4x1xf32> to vector<2x4x1xf32>
    %18 = arith.mulf %16, %17 : vector<2x4x1xf32>
    %c0_12 = arith.constant 0 : index
    %c0_13 = arith.constant 0 : index
    %c0_14 = arith.constant 0 : index
    %19 = vector.load %arg3[%c0_12, %c0_13, %c0_14] : memref<2x4x1xf32, #tpu.memory_space<vmem>>, vector<2x4x1xf32>
    %20 = vector.broadcast %4 : vector<1x4x1xf32> to vector<2x4x1xf32>
    %21 = arith.mulf %20, %18 : vector<2x4x1xf32>
    %22 = arith.subf %19, %21 : vector<2x4x1xf32>
    %c0_15 = arith.constant 0 : index
    %c0_16 = arith.constant 0 : index
    %c0_17 = arith.constant 0 : index
    %23 = vector.load %arg1[%c0_15, %c0_16, %c0_17] : memref<2x4x256xf32, #tpu.memory_space<vmem>>, vector<2x4x256xf32>
    %24 = vector.broadcast %18 : vector<2x4x1xf32> to vector<2x4x256xf32>
    %25 = arith.mulf %23, %24 : vector<2x4x256xf32>
    %26 = vector.broadcast %22 : vector<2x4x1xf32> to vector<2x4x256xf32>
    %27 = arith.addf %25, %26 : vector<2x4x256xf32>
    %c0_18 = arith.constant 0 : index
    %c0_19 = arith.constant 0 : index
    %c0_20 = arith.constant 0 : index
    %28 = vector.load %arg4[%c0_18, %c0_19, %c0_20] : memref<2x4x256xf32, #tpu.memory_space<vmem>>, vector<2x4x256xf32>
    tpu.vector_store %arg4[%c0_18, %c0_19, %c0_20], %27 {strides = array<i32>} : memref<2x4x256xf32, #tpu.memory_space<vmem>>, vector<2x4x256xf32>,
    return
  }
  func.func @transform_0(%arg0: i32) -> (i32, i32, i32) {
    %c0_i32 = arith.constant 0 : i32
    %c0_i32_0 = arith.constant 0 : i32
    %c0_i32_1 = arith.constant 0 : i32
    return %c0_i32, %arg0, %c0_i32_0 : i32, i32, i32
  }
  func.func @transform_1(%arg0: i32) -> (i32, i32, i32) {
    %c0_i32 = arith.constant 0 : i32
    %c0_i32_0 = arith.constant 0 : i32
    %c0_i32_1 = arith.constant 0 : i32
    return %c0_i32, %arg0, %c0_i32_0 : i32, i32, i32
  }
  func.func @transform_2(%arg0: i32) -> (i32, i32, i32) {
    %c0_i32 = arith.constant 0 : i32
    %c0_i32_0 = arith.constant 0 : i32
    %c0_i32_1 = arith.constant 0 : i32
    return %c0_i32, %arg0, %c0_i32_0 : i32, i32, i32
  }
  func.func @transform_3(%arg0: i32) -> (i32, i32, i32) {
    %c0_i32 = arith.constant 0 : i32
    %c0_i32_0 = arith.constant 0 : i32
    %c0_i32_1 = arith.constant 0 : i32
    return %c0_i32, %arg0, %c0_i32_0 : i32, i32, i32
  }
}

</mosaic_0001>

<bundles_post_ra>
// kernel: tpu_custom_call.1
= control target key start
LH: loop header
LB: loop body
LE: loop exit
PB: predicated region body
PF: predicated region fallthrough
CT: control target
= control target key end

     0   :  { %vm23_vm0 = vcmask 1043456   ;;  %s247_s0 = inlined_call_operand.vmem [shape: f32[2,4,256], index: 0, kind: input, shape index: {}]   ;;  %s248_s1 = inlined_call_operand.vmem [shape: f32[2,4,1], index: 1, kind: input, shape index: {}]   ;;  %s249_s2 = inlined_call_operand.vmem [shape: f32[2,4,1], index: 2, kind: input, shape index: {}]   ;;  %s250_s3 = inlined_call_operand.hbm [shape: f32[2,4,256], index: 3, kind: output, shape index: {}]  }
   0x1   :  { %v207_v0 = vld [vmem:[%s247_s0] sm:$0xff]  ;;  %v212_v1 = vld [vmem:[%s247_s0 + $0x8] sm:$0xff] }
   0x2   :  { %v19_v2 = vcombine.high %v207_v0, %v207_v0  ;;  %v20_v3 = vcombine.high %v212_v1, %v212_v1  ;;  %v24_v4 = vsel %vm23_vm0, %v207_v0, 0.0 }
   0x3   :  { %8 = vsyncpa [#allocation3], 0  ;;  %v27_v6 = vsel %vm23_vm0, %v212_v1, 0.0  ;;  %v179_v11 = vmov 839922192   ;;  %v39_v13 = vlaneseq  ;;  %v180_v33 = vmov 0  }
   0x4   :  { %v25_v5 = vsel %vm23_vm0, %v19_v2, 0.0  ;;  %v29_v8 = vsel %vm23_vm0, %v20_v3, 0.0  ;;  %v37_v12 = vunpack.c.l.s4 %v179_v11  ;;  %151 = vset.pattern.permute.xlu1 %v180_v33  ;;  %152 = vset.pattern.permute.xlu0 %v180_v33  ;;  %v66_v37 = vld [vmem:[%s248_s1] sm:$0xf]  ;;  %v67_v38 = vld [vmem:[%s248_s1 + $0x4] sm:$0xf] }
   0x5   :  { %v26_v7 = vadd.f32 %v25_v5, %v24_v4  ;;  %v40_v15 = vshrl.u32 %v39_v13, 7  ;;  %v70_v42 = vld [vmem:[%s249_s2] sm:$0xf]  ;;  %v71_v46 = vld [vmem:[%s249_s2 + $0x4] sm:$0xf]  ;;  %s181_s1 = smov [#allocation2]  }
   0x6   :  { %v38_v14 = vunpack.c.0.s8 %v37_v12  ;;  %s135_s23 = sshll.u32 %s181_s1, 4  ;;  %s136_s23 = int_to_ptr.vmem [resolvable:$true] %s135_s23 }
   0x7   :  { %v28_v9 = vadd.f32 %v27_v6, %v26_v7  ;;  %s157_s2 = scalar_lea.vmem %s136_s23, 256  ;;  %p162_p1 = scmp.lt.s32.totalorder %s136_s23, %s136_s23 }
   0x8   :  { %v41_v16 = vsub.s32 %v38_v14, %v40_v15  ;;  %p158_p0 = scmp.ne.s32.totalorder %s136_s23, %s157_s2  ;;  %p163_p2 = scmp.lt.s32.totalorder %s157_s2, %s157_s2 }
   0x9   :  { %v30_v10 = vadd.f32 %v29_v8, %v28_v9 }
   0xa   :  { %p164_p3 = por %p163_p2, %p162_p1 }
   0xb   :  { %31 = vadd.xlane.f32.xlu0 %v30_v10 }
   0xc   :  { %p165_p4 = pnand %p164_p3, %p158_p0 }
  0x94   :  { %v32_v17 = vpop.xlane.xlu0 %31 }
  0x95   :  { %v34_v18 = vmul.f32 0.001953125, %v32_v17 }
  0x97   :  { %v42_v19 = vrot.slane %v34_v18, %v41_v16 }
  0x99   :  { %v44_v20 = vsub.f32 %v207_v0, %v42_v19  ;;  %v45_v21 = vsub.f32 %v212_v1, %v42_v19 }
  0x9b   :  { %v46_v22 = vmul.f32 %v44_v20, %v44_v20  ;;  %v47_v23 = vmul.f32 %v45_v21, %v45_v21 }
  0x9d   :  { %v50_v24 = vcombine.high %v46_v22, %v46_v22  ;;  %v51_v25 = vcombine.high %v47_v23, %v47_v23  ;;  %v54_v26 = vsel %vm23_vm0, %v46_v22, 0.0  ;;  %v57_v29 = vsel %vm23_vm0, %v47_v23, 0.0 }
  0x9f   :  { %v55_v27 = vsel %vm23_vm0, %v50_v24, 0.0  ;;  %v59_v31 = vsel %vm23_vm0, %v51_v25, 0.0 }
  0xa0   :  { %v56_v28 = vadd.f32 %v55_v27, %v54_v26 }
  0xa2   :  { %v58_v30 = vadd.f32 %v57_v29, %v56_v28 }
  0xa4   :  { %v60_v32 = vadd.f32 %v59_v31, %v58_v30 }
  0xa6   :  { %61 = vadd.xlane.f32.xlu0 %v60_v32 }
 0x12f   :  { %v62_v34 = vpop.xlane.xlu0 %61 }
 0x130   :  { %v63_v35 = vmul.f32 0.001953125, %v62_v34 }
 0x132   :  { %v64_v36 = vadd.f32 1e-05, %v63_v35 }
 0x134   :  { %155 = vrsqrt.f32 %v64_v36 }
 0x141   :  { %v156_v39 = vpop.eup %155 }
 0x142   :  { %v68_v40 = vmul.f32 %v156_v39, %v66_v37  ;;  %v69_v41 = vmul.f32 %v156_v39, %v67_v38 }
 0x144   :  { %78 = vperm.xlu1 %151, %v68_v40   ;;  %v72_v43 = vmul.f32 %v68_v40, %v34_v18  ;;  %v73_v45 = vmul.f32 %v69_v41, %v34_v18 }
 0x146   :  { %v74_v44 = vsub.f32 %v70_v42, %v72_v43  ;;  %v75_v47 = vsub.f32 %v71_v46, %v73_v45 }
 0x148   :  { %82 = vperm.xlu1 %151, %v69_v41   ;;  %104 = vperm.xlu0 %152, %v74_v44  }
 0x14c   :  { %108 = vperm.xlu1 %151, %v75_v47  }
 0x1bf   :  { %v79_v48 = vpop.permute.xlu1 %78 }
 0x1c0   :  { %v90_v49 = vrot.slane %v79_v48, %v41_v16 }
 0x1c2   :  { %v100_v52 = vmul.f32 %v90_v49, %v207_v0 }
 0x1c3   :  { %v83_v50 = vpop.permute.xlu1 %82  ;;  %v105_v51 = vpop.permute.xlu0 %104 }
 0x1c4   :  { %v97_v53 = vrot.slane %v83_v50, %v41_v16  ;;  %v116_v54 = vrot.slane %v105_v51, %v41_v16 }
 0x1c6   :  { %v126_v55 = vadd.f32 %v116_v54, %v100_v52  ;;  %v101_v57 = vmul.f32 %v97_v53, %v212_v1 }
 0x1c7   :  { %v109_v56 = vpop.permute.xlu1 %108 }
 0x1c8   :  { %128 = vst [vmem:[#allocation2] sm:$0xff] %v126_v55  ;;  %v123_v58 = vrot.slane %v109_v56, %v41_v16 }
 0x1ca   :  { %v127_v59 = vadd.f32 %v123_v58, %v101_v57 }
 0x1cc   :  { %129 = vst [vmem:[#allocation2 + $0x8] sm:$0xff] %v127_v59 }
 0x1cd   :  { %168 = shalt.err (!%p165_p4)
}
 0x1ce   :  { %s182_s24 = smov 128   ;;  %s183_s25 = smov 8  }
 0x1cf   :  { %141 = dma.vmem_to_hbm [thread:$0]  %s136_s23, 256, %s250_s3, [#allocation3], %s182_s24, %s182_s24, %s183_s25  }
 0x1d0   :  { %177 = dma.done.wait [#allocation3], 256  }
 0x1d1   :  { %178 = vsyncadd [#allocation3], 4294967040 }
 0x1d2   :  { %145 = vsyncpa [#allocation3], 1 }

</bundles_post_ra>
